<compile_context>
chip_gen: v7x
topology: tpu7x:2x2x1
jax: 0.10.0
libtpu: 0.0.40
codegen_flags: <defaults>
</compile_context>

<pallas_src>
import jax
import jax.numpy as jnp
from jax.experimental import pallas as pl
from jax.experimental.pallas import tpu as pltpu

_LANES = 128

# Flat SMEM parameter layout: W1(48) | b1(6) | W2(24) | b2(4) | w3(4) | b3(1) -> 87.
_W1_OFF, _B1_OFF, _W2_OFF, _B2_OFF, _W3_OFF, _B3_OFF = 0, 48, 54, 78, 82, 86


def _round_up(n, m):
    return ((n + m - 1) // m) * m


# ----------------------------------------------------------------------------
# Kernel
# ----------------------------------------------------------------------------
def mlp_kernel(p_ref, x_ref, o_ref):
    # p_ref: SMEM (87,) f32 -- all weights/biases as scalars (splat per use).
    # x_ref: VMEM (8, S, 128) -- feature channel k is the dense slab x_ref[k].
    # o_ref: VMEM (S, 128)    -- one real result per element (lane-dense store).

    def sigmoid(v):
        # logistic via a single EUP tanh (cheaper than exp + divide)
        return 0.5 * jnp.tanh(0.5 * v) + 0.5

    # ---- Layer 1: 8 -> 6, unrolled scalar-broadcast MACs on the VPU ----
    # k-outer ordering keeps only 6 accumulators + 1 input channel live (low vreg pressure).
    acc1 = [None] * 6
    for k in range(8):
        xk = x_ref[k]                                   # (S, 128)
        for j in range(6):
            t = xk * p_ref[_W1_OFF + k * 6 + j]
            acc1[j] = t if acc1[j] is None else acc1[j] + t
    h1 = [sigmoid(acc1[j] + p_ref[_B1_OFF + j]) for j in range(6)]

    # ---- Layer 2: 6 -> 4 ----
    acc2 = [None] * 4
    for k in range(6):
        hk = h1[k]
        for j in range(4):
            t = hk * p_ref[_W2_OFF + k * 4 + j]
            acc2[j] = t if acc2[j] is None else acc2[j] + t
    h2 = [sigmoid(acc2[j] + p_ref[_B2_OFF + j]) for j in range(4)]

    # ---- Layer 3: 4 -> 1 (4 more MACs; no XLU reduce, no MXU) ----
    acc3 = h2[0] * p_ref[_W3_OFF]
    for k in range(1, 4):
        acc3 = acc3 + h2[k] * p_ref[_W3_OFF + k]
    o_ref[...] = sigmoid(acc3 + p_ref[_B3_OFF]).astype(o_ref.dtype)


# ----------------------------------------------------------------------------
# Host-side packing + wrapper
# ----------------------------------------------------------------------------
def pack_params(w1, b1, w2, b2, w3, b3):
    """Flatten all params into one (87,) f32 vector consumed from SMEM."""
    return jnp.concatenate([
        w1.reshape(-1), b1.reshape(-1),
        w2.reshape(-1), b2.reshape(-1),
        w3.reshape(-1), b3.reshape(-1),
    ]).astype(jnp.float32)


def _pick_tile_rows(rows_total, max_rows):
    # Block's second-to-last dim must be a multiple of 8 or equal the full extent.
    if rows_total <= 8:
        return rows_total                              # single step; block == full array
    if rows_total <= 2 * max_rows:
        # Aim for >=2 grid steps so both v7x TensorCores get work (no-op on v5e/v6e).
        return max(8, ((rows_total // 2) // 8) * 8)
    return max_rows


def mlp_forward(x, params, *, max_tile_rows=32):
    """x: (B, 8) f32, params: (87,) f32.  Returns (B, 1) f32."""
    B = x.shape[0]
    assert x.shape[1] == 8

    rows_total = -(-B // _LANES)                       # 128-lane rows covering the batch
    S = _pick_tile_rows(rows_total, max_tile_rows)     # sublane-rows per grid step (tile = S*128 rows)
    rows_pad = _round_up(rows_total, S)
    B_pad = rows_pad * _LANES
    if B_pad != B:
        x = jnp.pad(x, ((0, B_pad - B), (0, 0)))

    # One wrapper-side transpose (amortized), then a free reshape: feature channel k
    # becomes the dense (rows_pad, 128) slab x_t[k].  No in-kernel layout work.
    x_t = x.astype(jnp.float32).T.reshape(8, rows_pad, _LANES)

    out = pl.pallas_call(
        mlp_kernel,
        out_shape=jax.ShapeDtypeStruct((rows_pad, _LANES), jnp.float32),
        grid=(rows_pad // S,),
        in_specs=[
            pl.BlockSpec(memory_space=pltpu.MemorySpace.SMEM),    # params: 87 resident scalars
            pl.BlockSpec((8, S, _LANES), lambda i: (0, i, 0)),    # x: streamed batch tile
        ],
        out_specs=pl.BlockSpec((S, _LANES), lambda i: (i, 0)),    # lane-dense, non-replicated
        compiler_params=pltpu.CompilerParams(
            dimension_semantics=("parallel",),                    # shard batch tiles across TCs
        ),
    )(params, x_t)

    return out.reshape(-1)[:B].reshape(B, 1)


# ----------------------------------------------------------------------------
# Reference / init / test
# ----------------------------------------------------------------------------
def init_linear(key, fan_in, fan_out):
    # Mirrors torch.nn.Linear default init: U(-1/sqrt(fan_in), 1/sqrt(fan_in)).
    kw, kb = jax.random.split(key)
    bound = 1.0 / (fan_in ** 0.5)
    w = jax.random.uniform(kw, (fan_in, fan_out), jnp.float32, -bound, bound)
    b = jax.random.uniform(kb, (1, fan_out), jnp.float32, -bound, bound)
    return w, b


def reference_forward(x, w1, b1, w2, b2, w3, b3):
    h = jax.nn.sigmoid(x @ w1 + b1)
    h = jax.nn.sigmoid(h @ w2 + b2)
    return jax.nn.sigmoid(h @ w3 + b3)


if __name__ == "__main__":
    key = jax.random.PRNGKey(0)
    k_x, k1, k2, k3 = jax.random.split(key, 4)

    w1, b1 = init_linear(k1, 8, 6)
    w2, b2 = init_linear(k2, 6, 4)
    w3, b3 = init_linear(k3, 4, 1)
    params = pack_params(w1, b1, w2, b2, w3, b3)

    # Primary small-shape check (B=8) plus two batch sizes exercising the
    # single-step (non-multiple-of-8 rows) and multi-step (padded) grid paths.
    for B in (8, 777, 5000):
        x = jax.random.normal(jax.random.fold_in(k_x, B), (B, 8), jnp.float32)
        out = jax.block_until_ready(mlp_forward(x, params))
        ref = reference_forward(x, w1, b1, w2, b2, w3, b3)
        assert out.shape == (B, 1), out.shape
        err = float(jnp.max(jnp.abs(out - ref)))
        assert err < 2e-5, f"B={B} max abs err {err}"

    print("KERNEL_OK")
</pallas_src>

<mosaic_0001>
module attributes {stable_mosaic.version = 11 : i64} {
  func.func @mlp_kernel(%arg0: i32, %arg1: memref<87xf32, #tpu.memory_space<smem>>, %arg2: memref<8x1x128xf32, #tpu.memory_space<vmem>>, %arg3: memref<1x128xf32, #tpu.memory_space<vmem>>) attributes {dimension_semantics = [#tpu.dimension_semantics<parallel>], iteration_bounds = array<i64: 1>, scalar_prefetch = 0 : i64, scratch_operands = 0 : i64, tpu.core_type = #tpu.core_type<tc>, window_params = [{transform_indices = @transform_0, window_bounds = array<i64: 87>}, {transform_indices = @transform_1, window_bounds = array<i64: 8, 1, 128>}, {transform_indices = @transform_2, window_bounds = array<i64: 1, 128>}]} {
    %c0 = arith.constant 0 : index
    %c0_0 = arith.constant 0 : index
    %c0_1 = arith.constant 0 : index
    %0 = vector.load %arg2[%c0, %c0_0, %c0_1] : memref<8x1x128xf32, #tpu.memory_space<vmem>>, vector<1x1x128xf32>
    %1 = vector.shape_cast %0 : vector<1x1x128xf32> to vector<1x128xf32>
    %c0_2 = arith.constant 0 : index
    %2 = memref.load %arg1[%c0_2] : memref<87xf32, #tpu.memory_space<smem>>
    %3 = vector.broadcast %2 : f32 to vector<1x128xf32>
    %4 = arith.mulf %1, %3 : vector<1x128xf32>
    %c1 = arith.constant 1 : index
    %5 = memref.load %arg1[%c1] : memref<87xf32, #tpu.memory_space<smem>>
    %6 = vector.broadcast %5 : f32 to vector<1x128xf32>
    %7 = arith.mulf %1, %6 : vector<1x128xf32>
    %c2 = arith.constant 2 : index
    %8 = memref.load %arg1[%c2] : memref<87xf32, #tpu.memory_space<smem>>
    %9 = vector.broadcast %8 : f32 to vector<1x128xf32>
    %10 = arith.mulf %1, %9 : vector<1x128xf32>
    %c3 = arith.constant 3 : index
    %11 = memref.load %arg1[%c3] : memref<87xf32, #tpu.memory_space<smem>>
    %12 = vector.broadcast %11 : f32 to vector<1x128xf32>
    %13 = arith.mulf %1, %12 : vector<1x128xf32>
    %c4 = arith.constant 4 : index
    %14 = memref.load %arg1[%c4] : memref<87xf32, #tpu.memory_space<smem>>
    %15 = vector.broadcast %14 : f32 to vector<1x128xf32>
    %16 = arith.mulf %1, %15 : vector<1x128xf32>
    %c5 = arith.constant 5 : index
    %17 = memref.load %arg1[%c5] : memref<87xf32, #tpu.memory_space<smem>>
    %18 = vector.broadcast %17 : f32 to vector<1x128xf32>
    %19 = arith.mulf %1, %18 : vector<1x128xf32>
    %c1_3 = arith.constant 1 : index
    %c0_4 = arith.constant 0 : index
    %c0_5 = arith.constant 0 : index
    %20 = vector.load %arg2[%c1_3, %c0_4, %c0_5] : memref<8x1x128xf32, #tpu.memory_space<vmem>>, vector<1x1x128xf32>
    %21 = vector.shape_cast %20 : vector<1x1x128xf32> to vector<1x128xf32>
    %c6 = arith.constant 6 : index
    %22 = memref.load %arg1[%c6] : memref<87xf32, #tpu.memory_space<smem>>
    %23 = vector.broadcast %22 : f32 to vector<1x128xf32>
    %24 = arith.mulf %21, %23 : vector<1x128xf32>
    %25 = arith.addf %4, %24 : vector<1x128xf32>
    %c7 = arith.constant 7 : index
    %26 = memref.load %arg1[%c7] : memref<87xf32, #tpu.memory_space<smem>>
    %27 = vector.broadcast %26 : f32 to vector<1x128xf32>
    %28 = arith.mulf %21, %27 : vector<1x128xf32>
    %29 = arith.addf %7, %28 : vector<1x128xf32>
    %c8 = arith.constant 8 : index
    %30 = memref.load %arg1[%c8] : memref<87xf32, #tpu.memory_space<smem>>
    %31 = vector.broadcast %30 : f32 to vector<1x128xf32>
    %32 = arith.mulf %21, %31 : vector<1x128xf32>
    %33 = arith.addf %10, %32 : vector<1x128xf32>
    %c9 = arith.constant 9 : index
    %34 = memref.load %arg1[%c9] : memref<87xf32, #tpu.memory_space<smem>>
    %35 = vector.broadcast %34 : f32 to vector<1x128xf32>
    %36 = arith.mulf %21, %35 : vector<1x128xf32>
    %37 = arith.addf %13, %36 : vector<1x128xf32>
    %c10 = arith.constant 10 : index
    %38 = memref.load %arg1[%c10] : memref<87xf32, #tpu.memory_space<smem>>
    %39 = vector.broadcast %38 : f32 to vector<1x128xf32>
    %40 = arith.mulf %21, %39 : vector<1x128xf32>
    %41 = arith.addf %16, %40 : vector<1x128xf32>
    %c11 = arith.constant 11 : index
    %42 = memref.load %arg1[%c11] : memref<87xf32, #tpu.memory_space<smem>>
    %43 = vector.broadcast %42 : f32 to vector<1x128xf32>
    %44 = arith.mulf %21, %43 : vector<1x128xf32>
    %45 = arith.addf %19, %44 : vector<1x128xf32>
    %c2_6 = arith.constant 2 : index
    %c0_7 = arith.constant 0 : index
    %c0_8 = arith.constant 0 : index
    %46 = vector.load %arg2[%c2_6, %c0_7, %c0_8] : memref<8x1x128xf32, #tpu.memory_space<vmem>>, vector<1x1x128xf32>
    %47 = vector.shape_cast %46 : vector<1x1x128xf32> to vector<1x128xf32>
    %c12 = arith.constant 12 : index
    %48 = memref.load %arg1[%c12] : memref<87xf32, #tpu.memory_space<smem>>
    %49 = vector.broadcast %48 : f32 to vector<1x128xf32>
    %50 = arith.mulf %47, %49 : vector<1x128xf32>
    %51 = arith.addf %25, %50 : vector<1x128xf32>
    %c13 = arith.constant 13 : index
    %52 = memref.load %arg1[%c13] : memref<87xf32, #tpu.memory_space<smem>>
    %53 = vector.broadcast %52 : f32 to vector<1x128xf32>
    %54 = arith.mulf %47, %53 : vector<1x128xf32>
    %55 = arith.addf %29, %54 : vector<1x128xf32>
    %c14 = arith.constant 14 : index
    %56 = memref.load %arg1[%c14] : memref<87xf32, #tpu.memory_space<smem>>
    %57 = vector.broadcast %56 : f32 to vector<1x128xf32>
    %58 = arith.mulf %47, %57 : vector<1x128xf32>
    %59 = arith.addf %33, %58 : vector<1x128xf32>
    %c15 = arith.constant 15 : index
    %60 = memref.load %arg1[%c15] : memref<87xf32, #tpu.memory_space<smem>>
    %61 = vector.broadcast %60 : f32 to vector<1x128xf32>
    %62 = arith.mulf %47, %61 : vector<1x128xf32>
    %63 = arith.addf %37, %62 : vector<1x128xf32>
    %c16 = arith.constant 16 : index
    %64 = memref.load %arg1[%c16] : memref<87xf32, #tpu.memory_space<smem>>
    %65 = vector.broadcast %64 : f32 to vector<1x128xf32>
    %66 = arith.mulf %47, %65 : vector<1x128xf32>
    %67 = arith.addf %41, %66 : vector<1x128xf32>
    %c17 = arith.constant 17 : index
    %68 = memref.load %arg1[%c17] : memref<87xf32, #tpu.memory_space<smem>>
    %69 = vector.broadcast %68 : f32 to vector<1x128xf32>
    %70 = arith.mulf %47, %69 : vector<1x128xf32>
    %71 = arith.addf %45, %70 : vector<1x128xf32>
    %c3_9 = arith.constant 3 : index
    %c0_10 = arith.constant 0 : index
    %c0_11 = arith.constant 0 : index
    %72 = vector.load %arg2[%c3_9, %c0_10, %c0_11] : memref<8x1x128xf32, #tpu.memory_space<vmem>>, vector<1x1x128xf32>
    %73 = vector.shape_cast %72 : vector<1x1x128xf32> to vector<1x128xf32>
    %c18 = arith.constant 18 : index
    %74 = memref.load %arg1[%c18] : memref<87xf32, #tpu.memory_space<smem>>
    %75 = vector.broadcast %74 : f32 to vector<1x128xf32>
    %76 = arith.mulf %73, %75 : vector<1x128xf32>
    %77 = arith.addf %51, %76 : vector<1x128xf32>
    %c19 = arith.constant 19 : index
    %78 = memref.load %arg1[%c19] : memref<87xf32, #tpu.memory_space<smem>>
    %79 = vector.broadcast %78 : f32 to vector<1x128xf32>
    %80 = arith.mulf %73, %79 : vector<1x128xf32>
    %81 = arith.addf %55, %80 : vector<1x128xf32>
    %c20 = arith.constant 20 : index
    %82 = memref.load %arg1[%c20] : memref<87xf32, #tpu.memory_space<smem>>
    %83 = vector.broadcast %82 : f32 to vector<1x128xf32>
    %84 = arith.mulf %73, %83 : vector<1x128xf32>
    %85 = arith.addf %59, %84 : vector<1x128xf32>
    %c21 = arith.constant 21 : index
    %86 = memref.load %arg1[%c21] : memref<87xf32, #tpu.memory_space<smem>>
    %87 = vector.broadcast %86 : f32 to vector<1x128xf32>
    %88 = arith.mulf %73, %87 : vector<1x128xf32>
    %89 = arith.addf %63, %88 : vector<1x128xf32>
    %c22 = arith.constant 22 : index
    %90 = memref.load %arg1[%c22] : memref<87xf32, #tpu.memory_space<smem>>
    %91 = vector.broadcast %90 : f32 to vector<1x128xf32>
    %92 = arith.mulf %73, %91 : vector<1x128xf32>
    %93 = arith.addf %67, %92 : vector<1x128xf32>
    %c23 = arith.constant 23 : index
    %94 = memref.load %arg1[%c23] : memref<87xf32, #tpu.memory_space<smem>>
    %95 = vector.broadcast %94 : f32 to vector<1x128xf32>
    %96 = arith.mulf %73, %95 : vector<1x128xf32>
    %97 = arith.addf %71, %96 : vector<1x128xf32>
    %c4_12 = arith.constant 4 : index
    %c0_13 = arith.constant 0 : index
    %c0_14 = arith.constant 0 : index
    %98 = vector.load %arg2[%c4_12, %c0_13, %c0_14] : memref<8x1x128xf32, #tpu.memory_space<vmem>>, vector<1x1x128xf32>
    %99 = vector.shape_cast %98 : vector<1x1x128xf32> to vector<1x128xf32>
    %c24 = arith.constant 24 : index
    %100 = memref.load %arg1[%c24] : memref<87xf32, #tpu.memory_space<smem>>
    %101 = vector.broadcast %100 : f32 to vector<1x128xf32>
    %102 = arith.mulf %99, %101 : vector<1x128xf32>
    %103 = arith.addf %77, %102 : vector<1x128xf32>
    %c25 = arith.constant 25 : index
    %104 = memref.load %arg1[%c25] : memref<87xf32, #tpu.memory_space<smem>>
    %105 = vector.broadcast %104 : f32 to vector<1x128xf32>
    %106 = arith.mulf %99, %105 : vector<1x128xf32>
    %107 = arith.addf %81, %106 : vector<1x128xf32>
    %c26 = arith.constant 26 : index
    %108 = memref.load %arg1[%c26] : memref<87xf32, #tpu.memory_space<smem>>
    %109 = vector.broadcast %108 : f32 to vector<1x128xf32>
    %110 = arith.mulf %99, %109 : vector<1x128xf32>
    %111 = arith.addf %85, %110 : vector<1x128xf32>
    %c27 = arith.constant 27 : index
    %112 = memref.load %arg1[%c27] : memref<87xf32, #tpu.memory_space<smem>>
    %113 = vector.broadcast %112 : f32 to vector<1x128xf32>
    %114 = arith.mulf %99, %113 : vector<1x128xf32>
    %115 = arith.addf %89, %114 : vector<1x128xf32>
    %c28 = arith.constant 28 : index
    %116 = memref.load %arg1[%c28] : memref<87xf32, #tpu.memory_space<smem>>
    %117 = vector.broadcast %116 : f32 to vector<1x128xf32>
    %118 = arith.mulf %99, %117 : vector<1x128xf32>
    %119 = arith.addf %93, %118 : vector<1x128xf32>
    %c29 = arith.constant 29 : index
    %120 = memref.load %arg1[%c29] : memref<87xf32, #tpu.memory_space<smem>>
    %121 = vector.broadcast %120 : f32 to vector<1x128xf32>
    %122 = arith.mulf %99, %121 : vector<1x128xf32>
    %123 = arith.addf %97, %122 : vector<1x128xf32>
    %c5_15 = arith.constant 5 : index
    %c0_16 = arith.constant 0 : index
    %c0_17 = arith.constant 0 : index
    %124 = vector.load %arg2[%c5_15, %c0_16, %c0_17] : memref<8x1x128xf32, #tpu.memory_space<vmem>>, vector<1x1x128xf32>
    %125 = vector.shape_cast %124 : vector<1x1x128xf32> to vector<1x128xf32>
    %c30 = arith.constant 30 : index
    %126 = memref.load %arg1[%c30] : memref<87xf32, #tpu.memory_space<smem>>
    %127 = vector.broadcast %126 : f32 to vector<1x128xf32>
    %128 = arith.mulf %125, %127 : vector<1x128xf32>
    %129 = arith.addf %103, %128 : vector<1x128xf32>
    %c31 = arith.constant 31 : index
    %130 = memref.load %arg1[%c31] : memref<87xf32, #tpu.memory_space<smem>>
    %131 = vector.broadcast %130 : f32 to vector<1x128xf32>
    %132 = arith.mulf %125, %131 : vector<1x128xf32>
    %133 = arith.addf %107, %132 : vector<1x128xf32>
    %c32 = arith.constant 32 : index
    %134 = memref.load %arg1[%c32] : memref<87xf32, #tpu.memory_space<smem>>
    %135 = vector.broadcast %134 : f32 to vector<1x128xf32>
    %136 = arith.mulf %125, %135 : vector<1x128xf32>
    %137 = arith.addf %111, %136 : vector<1x128xf32>
    %c33 = arith.constant 33 : index
    %138 = memref.load %arg1[%c33] : memref<87xf32, #tpu.memory_space<smem>>
    %139 = vector.broadcast %138 : f32 to vector<1x128xf32>
    %140 = arith.mulf %125, %139 : vector<1x128xf32>
    %141 = arith.addf %115, %140 : vector<1x128xf32>
    %c34 = arith.constant 34 : index
    %142 = memref.load %arg1[%c34] : memref<87xf32, #tpu.memory_space<smem>>
    %143 = vector.broadcast %142 : f32 to vector<1x128xf32>
    %144 = arith.mulf %125, %143 : vector<1x128xf32>
    %145 = arith.addf %119, %144 : vector<1x128xf32>
    %c35 = arith.constant 35 : index
    %146 = memref.load %arg1[%c35] : memref<87xf32, #tpu.memory_space<smem>>
    %147 = vector.broadcast %146 : f32 to vector<1x128xf32>
    %148 = arith.mulf %125, %147 : vector<1x128xf32>
    %149 = arith.addf %123, %148 : vector<1x128xf32>
    %c6_18 = arith.constant 6 : index
    %c0_19 = arith.constant 0 : index
    %c0_20 = arith.constant 0 : index
    %150 = vector.load %arg2[%c6_18, %c0_19, %c0_20] : memref<8x1x128xf32, #tpu.memory_space<vmem>>, vector<1x1x128xf32>
    %151 = vector.shape_cast %150 : vector<1x1x128xf32> to vector<1x128xf32>
    %c36 = arith.constant 36 : index
    %152 = memref.load %arg1[%c36] : memref<87xf32, #tpu.memory_space<smem>>
    %153 = vector.broadcast %152 : f32 to vector<1x128xf32>
    %154 = arith.mulf %151, %153 : vector<1x128xf32>
    %155 = arith.addf %129, %154 : vector<1x128xf32>
    %c37 = arith.constant 37 : index
    %156 = memref.load %arg1[%c37] : memref<87xf32, #tpu.memory_space<smem>>
    %157 = vector.broadcast %156 : f32 to vector<1x128xf32>
    %158 = arith.mulf %151, %157 : vector<1x128xf32>
    %159 = arith.addf %133, %158 : vector<1x128xf32>
    %c38 = arith.constant 38 : index
    %160 = memref.load %arg1[%c38] : memref<87xf32, #tpu.memory_space<smem>>
    %161 = vector.broadcast %160 : f32 to vector<1x128xf32>
    %162 = arith.mulf %151, %161 : vector<1x128xf32>
    %163 = arith.addf %137, %162 : vector<1x128xf32>
    %c39 = arith.constant 39 : index
    %164 = memref.load %arg1[%c39] : memref<87xf32, #tpu.memory_space<smem>>
    %165 = vector.broadcast %164 : f32 to vector<1x128xf32>
    %166 = arith.mulf %151, %165 : vector<1x128xf32>
    %167 = arith.addf %141, %166 : vector<1x128xf32>
    %c40 = arith.constant 40 : index
    %168 = memref.load %arg1[%c40] : memref<87xf32, #tpu.memory_space<smem>>
    %169 = vector.broadcast %168 : f32 to vector<1x128xf32>
    %170 = arith.mulf %151, %169 : vector<1x128xf32>
    %171 = arith.addf %145, %170 : vector<1x128xf32>
    %c41 = arith.constant 41 : index
    %172 = memref.load %arg1[%c41] : memref<87xf32, #tpu.memory_space<smem>>
    %173 = vector.broadcast %172 : f32 to vector<1x128xf32>
    %174 = arith.mulf %151, %173 : vector<1x128xf32>
    %175 = arith.addf %149, %174 : vector<1x128xf32>
    %c7_21 = arith.constant 7 : index
    %c0_22 = arith.constant 0 : index
    %c0_23 = arith.constant 0 : index
    %176 = vector.load %arg2[%c7_21, %c0_22, %c0_23] : memref<8x1x128xf32, #tpu.memory_space<vmem>>, vector<1x1x128xf32>
    %177 = vector.shape_cast %176 : vector<1x1x128xf32> to vector<1x128xf32>
    %c42 = arith.constant 42 : index
    %178 = memref.load %arg1[%c42] : memref<87xf32, #tpu.memory_space<smem>>
    %179 = vector.broadcast %178 : f32 to vector<1x128xf32>
    %180 = arith.mulf %177, %179 : vector<1x128xf32>
    %181 = arith.addf %155, %180 : vector<1x128xf32>
    %c43 = arith.constant 43 : index
    %182 = memref.load %arg1[%c43] : memref<87xf32, #tpu.memory_space<smem>>
    %183 = vector.broadcast %182 : f32 to vector<1x128xf32>
    %184 = arith.mulf %177, %183 : vector<1x128xf32>
    %185 = arith.addf %159, %184 : vector<1x128xf32>
    %c44 = arith.constant 44 : index
    %186 = memref.load %arg1[%c44] : memref<87xf32, #tpu.memory_space<smem>>
    %187 = vector.broadcast %186 : f32 to vector<1x128xf32>
    %188 = arith.mulf %177, %187 : vector<1x128xf32>
    %189 = arith.addf %163, %188 : vector<1x128xf32>
    %c45 = arith.constant 45 : index
    %190 = memref.load %arg1[%c45] : memref<87xf32, #tpu.memory_space<smem>>
    %191 = vector.broadcast %190 : f32 to vector<1x128xf32>
    %192 = arith.mulf %177, %191 : vector<1x128xf32>
    %193 = arith.addf %167, %192 : vector<1x128xf32>
    %c46 = arith.constant 46 : index
    %194 = memref.load %arg1[%c46] : memref<87xf32, #tpu.memory_space<smem>>
    %195 = vector.broadcast %194 : f32 to vector<1x128xf32>
    %196 = arith.mulf %177, %195 : vector<1x128xf32>
    %197 = arith.addf %171, %196 : vector<1x128xf32>
    %c47 = arith.constant 47 : index
    %198 = memref.load %arg1[%c47] : memref<87xf32, #tpu.memory_space<smem>>
    %199 = vector.broadcast %198 : f32 to vector<1x128xf32>
    %200 = arith.mulf %177, %199 : vector<1x128xf32>
    %201 = arith.addf %175, %200 : vector<1x128xf32>
    %c48 = arith.constant 48 : index
    %202 = memref.load %arg1[%c48] : memref<87xf32, #tpu.memory_space<smem>>
    %203 = vector.broadcast %202 : f32 to vector<1x128xf32>
    %204 = arith.addf %181, %203 : vector<1x128xf32>
    %cst = arith.constant 5.000000e-01 : f32
    %205 = vector.broadcast %cst : f32 to vector<1x128xf32>
    %206 = arith.mulf %205, %204 : vector<1x128xf32>
    %207 = math.tanh %206 : vector<1x128xf32>
    %cst_24 = arith.constant 5.000000e-01 : f32
    %208 = vector.broadcast %cst_24 : f32 to vector<1x128xf32>
    %209 = arith.mulf %208, %207 : vector<1x128xf32>
    %cst_25 = arith.constant 5.000000e-01 : f32
    %210 = vector.broadcast %cst_25 : f32 to vector<1x128xf32>
    %211 = arith.addf %209, %210 : vector<1x128xf32>
    %c49 = arith.constant 49 : index
    %212 = memref.load %arg1[%c49] : memref<87xf32, #tpu.memory_space<smem>>
    %213 = vector.broadcast %212 : f32 to vector<1x128xf32>
    %214 = arith.addf %185, %213 : vector<1x128xf32>
    %cst_26 = arith.constant 5.000000e-01 : f32
    %215 = vector.broadcast %cst_26 : f32 to vector<1x128xf32>
    %216 = arith.mulf %215, %214 : vector<1x128xf32>
    %217 = math.tanh %216 : vector<1x128xf32>
    %cst_27 = arith.constant 5.000000e-01 : f32
    %218 = vector.broadcast %cst_27 : f32 to vector<1x128xf32>
    %219 = arith.mulf %218, %217 : vector<1x128xf32>
    %cst_28 = arith.constant 5.000000e-01 : f32
    %220 = vector.broadcast %cst_28 : f32 to vector<1x128xf32>
    %221 = arith.addf %219, %220 : vector<1x128xf32>
    %c50 = arith.constant 50 : index
    %222 = memref.load %arg1[%c50] : memref<87xf32, #tpu.memory_space<smem>>
    %223 = vector.broadcast %222 : f32 to vector<1x128xf32>
    %224 = arith.addf %189, %223 : vector<1x128xf32>
    %cst_29 = arith.constant 5.000000e-01 : f32
    %225 = vector.broadcast %cst_29 : f32 to vector<1x128xf32>
    %226 = arith.mulf %225, %224 : vector<1x128xf32>
    %227 = math.tanh %226 : vector<1x128xf32>
    %cst_30 = arith.constant 5.000000e-01 : f32
    %228 = vector.broadcast %cst_30 : f32 to vector<1x128xf32>
    %229 = arith.mulf %228, %227 : vector<1x128xf32>
    %cst_31 = arith.constant 5.000000e-01 : f32
    %230 = vector.broadcast %cst_31 : f32 to vector<1x128xf32>
    %231 = arith.addf %229, %230 : vector<1x128xf32>
    %c51 = arith.constant 51 : index
    %232 = memref.load %arg1[%c51] : memref<87xf32, #tpu.memory_space<smem>>
    %233 = vector.broadcast %232 : f32 to vector<1x128xf32>
    %234 = arith.addf %193, %233 : vector<1x128xf32>
    %cst_32 = arith.constant 5.000000e-01 : f32
    %235 = vector.broadcast %cst_32 : f32 to vector<1x128xf32>
    %236 = arith.mulf %235, %234 : vector<1x128xf32>
    %237 = math.tanh %236 : vector<1x128xf32>
    %cst_33 = arith.constant 5.000000e-01 : f32
    %238 = vector.broadcast %cst_33 : f32 to vector<1x128xf32>
    %239 = arith.mulf %238, %237 : vector<1x128xf32>
    %cst_34 = arith.constant 5.000000e-01 : f32
    %240 = vector.broadcast %cst_34 : f32 to vector<1x128xf32>
    %241 = arith.addf %239, %240 : vector<1x128xf32>
    %c52 = arith.constant 52 : index
    %242 = memref.load %arg1[%c52] : memref<87xf32, #tpu.memory_space<smem>>
    %243 = vector.broadcast %242 : f32 to vector<1x128xf32>
    %244 = arith.addf %197, %243 : vector<1x128xf32>
    %cst_35 = arith.constant 5.000000e-01 : f32
    %245 = vector.broadcast %cst_35 : f32 to vector<1x128xf32>
    %246 = arith.mulf %245, %244 : vector<1x128xf32>
    %247 = math.tanh %246 : vector<1x128xf32>
    %cst_36 = arith.constant 5.000000e-01 : f32
    %248 = vector.broadcast %cst_36 : f32 to vector<1x128xf32>
    %249 = arith.mulf %248, %247 : vector<1x128xf32>
    %cst_37 = arith.constant 5.000000e-01 : f32
    %250 = vector.broadcast %cst_37 : f32 to vector<1x128xf32>
    %251 = arith.addf %249, %250 : vector<1x128xf32>
    %c53 = arith.constant 53 : index
    %252 = memref.load %arg1[%c53] : memref<87xf32, #tpu.memory_space<smem>>
    %253 = vector.broadcast %252 : f32 to vector<1x128xf32>
    %254 = arith.addf %201, %253 : vector<1x128xf32>
    %cst_38 = arith.constant 5.000000e-01 : f32
    %255 = vector.broadcast %cst_38 : f32 to vector<1x128xf32>
    %256 = arith.mulf %255, %254 : vector<1x128xf32>
    %257 = math.tanh %256 : vector<1x128xf32>
    %cst_39 = arith.constant 5.000000e-01 : f32
    %258 = vector.broadcast %cst_39 : f32 to vector<1x128xf32>
    %259 = arith.mulf %258, %257 : vector<1x128xf32>
    %cst_40 = arith.constant 5.000000e-01 : f32
    %260 = vector.broadcast %cst_40 : f32 to vector<1x128xf32>
    %261 = arith.addf %259, %260 : vector<1x128xf32>
    %c54 = arith.constant 54 : index
    %262 = memref.load %arg1[%c54] : memref<87xf32, #tpu.memory_space<smem>>
    %263 = vector.broadcast %262 : f32 to vector<1x128xf32>
    %264 = arith.mulf %211, %263 : vector<1x128xf32>
    %c55 = arith.constant 55 : index
    %265 = memref.load %arg1[%c55] : memref<87xf32, #tpu.memory_space<smem>>
    %266 = vector.broadcast %265 : f32 to vector<1x128xf32>
    %267 = arith.mulf %211, %266 : vector<1x128xf32>
    %c56 = arith.constant 56 : index
    %268 = memref.load %arg1[%c56] : memref<87xf32, #tpu.memory_space<smem>>
    %269 = vector.broadcast %268 : f32 to vector<1x128xf32>
    %270 = arith.mulf %211, %269 : vector<1x128xf32>
    %c57 = arith.constant 57 : index
    %271 = memref.load %arg1[%c57] : memref<87xf32, #tpu.memory_space<smem>>
    %272 = vector.broadcast %271 : f32 to vector<1x128xf32>
    %273 = arith.mulf %211, %272 : vector<1x128xf32>
    %c58 = arith.constant 58 : index
    %274 = memref.load %arg1[%c58] : memref<87xf32, #tpu.memory_space<smem>>
    %275 = vector.broadcast %274 : f32 to vector<1x128xf32>
    %276 = arith.mulf %221, %275 : vector<1x128xf32>
    %277 = arith.addf %264, %276 : vector<1x128xf32>
    %c59 = arith.constant 59 : index
    %278 = memref.load %arg1[%c59] : memref<87xf32, #tpu.memory_space<smem>>
    %279 = vector.broadcast %278 : f32 to vector<1x128xf32>
    %280 = arith.mulf %221, %279 : vector<1x128xf32>
    %281 = arith.addf %267, %280 : vector<1x128xf32>
    %c60 = arith.constant 60 : index
    %282 = memref.load %arg1[%c60] : memref<87xf32, #tpu.memory_space<smem>>
    %283 = vector.broadcast %282 : f32 to vector<1x128xf32>
    %284 = arith.mulf %221, %283 : vector<1x128xf32>
    %285 = arith.addf %270, %284 : vector<1x128xf32>
    %c61 = arith.constant 61 : index
    %286 = memref.load %arg1[%c61] : memref<87xf32, #tpu.memory_space<smem>>
    %287 = vector.broadcast %286 : f32 to vector<1x128xf32>
    %288 = arith.mulf %221, %287 : vector<1x128xf32>
    %289 = arith.addf %273, %288 : vector<1x128xf32>
    %c62 = arith.constant 62 : index
    %290 = memref.load %arg1[%c62] : memref<87xf32, #tpu.memory_space<smem>>
    %291 = vector.broadcast %290 : f32 to vector<1x128xf32>
    %292 = arith.mulf %231, %291 : vector<1x128xf32>
    %293 = arith.addf %277, %292 : vector<1x128xf32>
    %c63 = arith.constant 63 : index
    %294 = memref.load %arg1[%c63] : memref<87xf32, #tpu.memory_space<smem>>
    %295 = vector.broadcast %294 : f32 to vector<1x128xf32>
    %296 = arith.mulf %231, %295 : vector<1x128xf32>
    %297 = arith.addf %281, %296 : vector<1x128xf32>
    %c64 = arith.constant 64 : index
    %298 = memref.load %arg1[%c64] : memref<87xf32, #tpu.memory_space<smem>>
    %299 = vector.broadcast %298 : f32 to vector<1x128xf32>
    %300 = arith.mulf %231, %299 : vector<1x128xf32>
    %301 = arith.addf %285, %300 : vector<1x128xf32>
    %c65 = arith.constant 65 : index
    %302 = memref.load %arg1[%c65] : memref<87xf32, #tpu.memory_space<smem>>
    %303 = vector.broadcast %302 : f32 to vector<1x128xf32>
    %304 = arith.mulf %231, %303 : vector<1x128xf32>
    %305 = arith.addf %289, %304 : vector<1x128xf32>
    %c66 = arith.constant 66 : index
    %306 = memref.load %arg1[%c66] : memref<87xf32, #tpu.memory_space<smem>>
    %307 = vector.broadcast %306 : f32 to vector<1x128xf32>
    %308 = arith.mulf %241, %307 : vector<1x128xf32>
    %309 = arith.addf %293, %308 : vector<1x128xf32>
    %c67 = arith.constant 67 : index
    %310 = memref.load %arg1[%c67] : memref<87xf32, #tpu.memory_space<smem>>
    %311 = vector.broadcast %310 : f32 to vector<1x128xf32>
    %312 = arith.mulf %241, %311 : vector<1x128xf32>
    %313 = arith.addf %297, %312 : vector<1x128xf32>
    %c68 = arith.constant 68 : index
    %314 = memref.load %arg1[%c68] : memref<87xf32, #tpu.memory_space<smem>>
    %315 = vector.broadcast %314 : f32 to vector<1x128xf32>
    %316 = arith.mulf %241, %315 : vector<1x128xf32>
    %317 = arith.addf %301, %316 : vector<1x128xf32>
    %c69 = arith.constant 69 : index
    %318 = memref.load %arg1[%c69] : memref<87xf32, #tpu.memory_space<smem>>
    %319 = vector.broadcast %318 : f32 to vector<1x128xf32>
    %320 = arith.mulf %241, %319 : vector<1x128xf32>
    %321 = arith.addf %305, %320 : vector<1x128xf32>
    %c70 = arith.constant 70 : index
    %322 = memref.load %arg1[%c70] : memref<87xf32, #tpu.memory_space<smem>>
    %323 = vector.broadcast %322 : f32 to vector<1x128xf32>
    %324 = arith.mulf %251, %323 : vector<1x128xf32>
    %325 = arith.addf %309, %324 : vector<1x128xf32>
    %c71 = arith.constant 71 : index
    %326 = memref.load %arg1[%c71] : memref<87xf32, #tpu.memory_space<smem>>
    %327 = vector.broadcast %326 : f32 to vector<1x128xf32>
    %328 = arith.mulf %251, %327 : vector<1x128xf32>
    %329 = arith.addf %313, %328 : vector<1x128xf32>
    %c72 = arith.constant 72 : index
    %330 = memref.load %arg1[%c72] : memref<87xf32, #tpu.memory_space<smem>>
    %331 = vector.broadcast %330 : f32 to vector<1x128xf32>
    %332 = arith.mulf %251, %331 : vector<1x128xf32>
    %333 = arith.addf %317, %332 : vector<1x128xf32>
    %c73 = arith.constant 73 : index
    %334 = memref.load %arg1[%c73] : memref<87xf32, #tpu.memory_space<smem>>
    %335 = vector.broadcast %334 : f32 to vector<1x128xf32>
    %336 = arith.mulf %251, %335 : vector<1x128xf32>
    %337 = arith.addf %321, %336 : vector<1x128xf32>
    %c74 = arith.constant 74 : index
    %338 = memref.load %arg1[%c74] : memref<87xf32, #tpu.memory_space<smem>>
    %339 = vector.broadcast %338 : f32 to vector<1x128xf32>
    %340 = arith.mulf %261, %339 : vector<1x128xf32>
    %341 = arith.addf %325, %340 : vector<1x128xf32>
    %c75 = arith.constant 75 : index
    %342 = memref.load %arg1[%c75] : memref<87xf32, #tpu.memory_space<smem>>
    %343 = vector.broadcast %342 : f32 to vector<1x128xf32>
    %344 = arith.mulf %261, %343 : vector<1x128xf32>
    %345 = arith.addf %329, %344 : vector<1x128xf32>
    %c76 = arith.constant 76 : index
    %346 = memref.load %arg1[%c76] : memref<87xf32, #tpu.memory_space<smem>>
    %347 = vector.broadcast %346 : f32 to vector<1x128xf32>
    %348 = arith.mulf %261, %347 : vector<1x128xf32>
    %349 = arith.addf %333, %348 : vector<1x128xf32>
    %c77 = arith.constant 77 : index
    %350 = memref.load %arg1[%c77] : memref<87xf32, #tpu.memory_space<smem>>
    %351 = vector.broadcast %350 : f32 to vector<1x128xf32>
    %352 = arith.mulf %261, %351 : vector<1x128xf32>
    %353 = arith.addf %337, %352 : vector<1x128xf32>
    %c78 = arith.constant 78 : index
    %354 = memref.load %arg1[%c78] : memref<87xf32, #tpu.memory_space<smem>>
    %355 = vector.broadcast %354 : f32 to vector<1x128xf32>
    %356 = arith.addf %341, %355 : vector<1x128xf32>
    %cst_41 = arith.constant 5.000000e-01 : f32
    %357 = vector.broadcast %cst_41 : f32 to vector<1x128xf32>
    %358 = arith.mulf %357, %356 : vector<1x128xf32>
    %359 = math.tanh %358 : vector<1x128xf32>
    %cst_42 = arith.constant 5.000000e-01 : f32
    %360 = vector.broadcast %cst_42 : f32 to vector<1x128xf32>
    %361 = arith.mulf %360, %359 : vector<1x128xf32>
    %cst_43 = arith.constant 5.000000e-01 : f32
    %362 = vector.broadcast %cst_43 : f32 to vector<1x128xf32>
    %363 = arith.addf %361, %362 : vector<1x128xf32>
    %c79 = arith.constant 79 : index
    %364 = memref.load %arg1[%c79] : memref<87xf32, #tpu.memory_space<smem>>
    %365 = vector.broadcast %364 : f32 to vector<1x128xf32>
    %366 = arith.addf %345, %365 : vector<1x128xf32>
    %cst_44 = arith.constant 5.000000e-01 : f32
    %367 = vector.broadcast %cst_44 : f32 to vector<1x128xf32>
    %368 = arith.mulf %367, %366 : vector<1x128xf32>
    %369 = math.tanh %368 : vector<1x128xf32>
    %cst_45 = arith.constant 5.000000e-01 : f32
    %370 = vector.broadcast %cst_45 : f32 to vector<1x128xf32>
    %371 = arith.mulf %370, %369 : vector<1x128xf32>
    %cst_46 = arith.constant 5.000000e-01 : f32
    %372 = vector.broadcast %cst_46 : f32 to vector<1x128xf32>
    %373 = arith.addf %371, %372 : vector<1x128xf32>
    %c80 = arith.constant 80 : index
    %374 = memref.load %arg1[%c80] : memref<87xf32, #tpu.memory_space<smem>>
    %375 = vector.broadcast %374 : f32 to vector<1x128xf32>
    %376 = arith.addf %349, %375 : vector<1x128xf32>
    %cst_47 = arith.constant 5.000000e-01 : f32
    %377 = vector.broadcast %cst_47 : f32 to vector<1x128xf32>
    %378 = arith.mulf %377, %376 : vector<1x128xf32>
    %379 = math.tanh %378 : vector<1x128xf32>
    %cst_48 = arith.constant 5.000000e-01 : f32
    %380 = vector.broadcast %cst_48 : f32 to vector<1x128xf32>
    %381 = arith.mulf %380, %379 : vector<1x128xf32>
    %cst_49 = arith.constant 5.000000e-01 : f32
    %382 = vector.broadcast %cst_49 : f32 to vector<1x128xf32>
    %383 = arith.addf %381, %382 : vector<1x128xf32>
    %c81 = arith.constant 81 : index
    %384 = memref.load %arg1[%c81] : memref<87xf32, #tpu.memory_space<smem>>
    %385 = vector.broadcast %384 : f32 to vector<1x128xf32>
    %386 = arith.addf %353, %385 : vector<1x128xf32>
    %cst_50 = arith.constant 5.000000e-01 : f32
    %387 = vector.broadcast %cst_50 : f32 to vector<1x128xf32>
    %388 = arith.mulf %387, %386 : vector<1x128xf32>
    %389 = math.tanh %388 : vector<1x128xf32>
    %cst_51 = arith.constant 5.000000e-01 : f32
    %390 = vector.broadcast %cst_51 : f32 to vector<1x128xf32>
    %391 = arith.mulf %390, %389 : vector<1x128xf32>
    %cst_52 = arith.constant 5.000000e-01 : f32
    %392 = vector.broadcast %cst_52 : f32 to vector<1x128xf32>
    %393 = arith.addf %391, %392 : vector<1x128xf32>
    %c82 = arith.constant 82 : index
    %394 = memref.load %arg1[%c82] : memref<87xf32, #tpu.memory_space<smem>>
    %395 = vector.broadcast %394 : f32 to vector<1x128xf32>
    %396 = arith.mulf %363, %395 : vector<1x128xf32>
    %c83 = arith.constant 83 : index
    %397 = memref.load %arg1[%c83] : memref<87xf32, #tpu.memory_space<smem>>
    %398 = vector.broadcast %397 : f32 to vector<1x128xf32>
    %399 = arith.mulf %373, %398 : vector<1x128xf32>
    %400 = arith.addf %396, %399 : vector<1x128xf32>
    %c84 = arith.constant 84 : index
    %401 = memref.load %arg1[%c84] : memref<87xf32, #tpu.memory_space<smem>>
    %402 = vector.broadcast %401 : f32 to vector<1x128xf32>
    %403 = arith.mulf %383, %402 : vector<1x128xf32>
    %404 = arith.addf %400, %403 : vector<1x128xf32>
    %c85 = arith.constant 85 : index
    %405 = memref.load %arg1[%c85] : memref<87xf32, #tpu.memory_space<smem>>
    %406 = vector.broadcast %405 : f32 to vector<1x128xf32>
    %407 = arith.mulf %393, %406 : vector<1x128xf32>
    %408 = arith.addf %404, %407 : vector<1x128xf32>
    %c86 = arith.constant 86 : index
    %409 = memref.load %arg1[%c86] : memref<87xf32, #tpu.memory_space<smem>>
    %410 = vector.broadcast %409 : f32 to vector<1x128xf32>
    %411 = arith.addf %408, %410 : vector<1x128xf32>
    %cst_53 = arith.constant 5.000000e-01 : f32
    %412 = vector.broadcast %cst_53 : f32 to vector<1x128xf32>
    %413 = arith.mulf %412, %411 : vector<1x128xf32>
    %414 = math.tanh %413 : vector<1x128xf32>
    %cst_54 = arith.constant 5.000000e-01 : f32
    %415 = vector.broadcast %cst_54 : f32 to vector<1x128xf32>
    %416 = arith.mulf %415, %414 : vector<1x128xf32>
    %cst_55 = arith.constant 5.000000e-01 : f32
    %417 = vector.broadcast %cst_55 : f32 to vector<1x128xf32>
    %418 = arith.addf %416, %417 : vector<1x128xf32>
    %c0_56 = arith.constant 0 : index
    %c0_57 = arith.constant 0 : index
    %419 = vector.load %arg3[%c0_56, %c0_57] : memref<1x128xf32, #tpu.memory_space<vmem>>, vector<1x128xf32>
    tpu.vector_store %arg3[%c0_56, %c0_57], %418 {strides = array<i32>} : memref<1x128xf32, #tpu.memory_space<vmem>>, vector<1x128xf32>,
    return
  }
  func.func @transform_0(%arg0: i32) -> i32 {
    %c0_i32 = arith.constant 0 : i32
    %c0_i32_0 = arith.constant 0 : i32
    return %c0_i32 : i32
  }
  func.func @transform_1(%arg0: i32) -> (i32, i32, i32) {
    %c0_i32 = arith.constant 0 : i32
    %c0_i32_0 = arith.constant 0 : i32
    %c0_i32_1 = arith.constant 0 : i32
    return %c0_i32, %arg0, %c0_i32_0 : i32, i32, i32
  }
  func.func @transform_2(%arg0: i32) -> (i32, i32) {
    %c0_i32 = arith.constant 0 : i32
    %c0_i32_0 = arith.constant 0 : i32
    return %arg0, %c0_i32 : i32, i32
  }
}

</mosaic_0001>

<bundles_post_ra>
// kernel: tpu_custom_call.1
= control target key start
LH: loop header
LB: loop body
LE: loop exit
PB: predicated region body
PF: predicated region fallthrough
CT: control target
= control target key end

     0   :  { %7 = vsyncpa [#allocation5], 0  ;;  %s890_s0 = inlined_call_operand.hbm [shape: f32[87], index: 0, kind: input, shape index: {}]   ;;  %s891_s1 = inlined_call_operand.hbm [shape: f32[8,1,128], index: 1, kind: input, shape index: {}]   ;;  %s892_s2 = inlined_call_operand.hbm [shape: f32[1,128], index: 2, kind: output, shape index: {}]  }
   0x1   :  { %8 = vsyncpa [#allocation3], 0 }
   0x2   :  { %9 = vsyncpa [#allocation4], 0  ;;  %s552_s11 = scalar_lea.hbm %s890_s0, 16 }
   0x3   :  { %p553_p0 = scmp.ne.s32.totalorder %s890_s0, %s552_s11  ;;  %p556_p1 = scmp.lt.u32.totalorder %s552_s11, %s890_s0 }
   0x5   :  { %p558_p2 = pnand %p556_p1, %p553_p0 }
   0x7   :  { %561 = shalt.err (!%p558_p2)
}
   0x8   :  { %s612_s16 = smov [#allocation2]   ;;  %s613_s19 = smov [#allocation6]  }
   0x9   :  { %17 = dma.hbm_to_smem %s890_s0, 16, %s612_s16, [#allocation5]  }
   0xa   :  { %s23_s20 = sshll.u32 %s613_s19, 4  ;;  %s562_s23 = scalar_lea.hbm %s891_s1, 128  ;;  %s24_s20 = int_to_ptr.vmem [resolvable:$true] %s23_s20 }
   0xb   :  { %p563_p3 = scmp.ne.s32.totalorder %s891_s1, %s562_s23  ;;  %p566_p4 = scmp.lt.u32.totalorder %s562_s23, %s891_s1 }
   0xd   :  { %p568_p5 = pnand %p566_p4, %p563_p3 }
   0xf   :  { %571 = shalt.err (!%p568_p5)
}
  0x10   :  { %s572_s28 = scalar_lea.vmem %s24_s20, 128  ;;  %p577_p7 = scmp.lt.s32.totalorder %s24_s20, %s24_s20 }
  0x11   :  { %p573_p6 = scmp.ne.s32.totalorder %s24_s20, %s572_s28  ;;  %p578_p8 = scmp.lt.s32.totalorder %s572_s28, %s572_s28 }
  0x13   :  { %p579_p9 = por %p578_p8, %p577_p7 }
  0x15   :  { %p580_p10 = pnand %p579_p9, %p573_p6 }
  0x17   :  { %583 = shalt.err (!%p580_p10)
}
  0x18   :  { %s614_s0 = smov 16   ;;  %s615_s29 = smov 1  }
  0x19   :  { %29 = dma.hbm_to_vmem [thread:$0]  %s891_s1, 128, %s24_s20, [#allocation3], %s614_s0, %s614_s0, %s615_s29  }
  0x1a   :  { %606 = dma.done.wait [#allocation5], 16  }
  0x1b   :  { %607 = vsyncadd [#allocation5], 4294967280 }
  0x1c   :  { %608 = dma.done.wait [#allocation3], 128  }
  0x1d   :  { %609 = vsyncadd [#allocation3], 4294967168 }
  0x1e   :  { %36 = sfence }
  0x1f   :  { %s38_s4 = sld [smem:[#allocation2]]  ;;  %s439_s5 = sld [smem:[#allocation2 + $0x1]]  ;;  %v37_v0 = vld [vmem:[#allocation6] sm:$0x1]  ;;  %v57_v7 = vld [vmem:[#allocation6 + $0x1] sm:$0x1] }
  0x20   :  { %s440_s6 = sld [smem:[#allocation2 + $0x2]]  ;;  %s441_s7 = sld [smem:[#allocation2 + $0x3]]  ;;  %v83_v24 = vld [vmem:[#allocation6 + $0x2] sm:$0x1]  ;;  %v109_v41 = vld [vmem:[#allocation6 + $0x3] sm:$0x1] }
  0x21   :  { %s442_s8 = sld [smem:[#allocation2 + $0x4]]  ;;  %s443_s9 = sld [smem:[#allocation2 + $0x5]]  ;;  %v135_v62 = vld [vmem:[#allocation6 + $0x4] sm:$0x1] }
  0x22   :  { %s444_s10 = sld [smem:[#allocation2 + $0x6]]  ;;  %s445_s11 = sld [smem:[#allocation2 + $0x7]] }
  0x23   :  { %s656_s12 = sld [smem:[#allocation2 + $0x8]]  ;;  %s658_s13 = sld [smem:[#allocation2 + $0x9]] }
  0x24   :  { %s660_s14 = sld [smem:[#allocation2 + $0xa]]  ;;  %s662_s1 = sld [smem:[#allocation2 + $0xb]] }
  0x25   :  { %v39_v1 = vstv %s38_s4  ;;  %v42_v2 = vstv %s439_s5  ;;  %s664_s15 = sld [smem:[#allocation2 + $0xc]]  ;;  %s666_s16 = sld [smem:[#allocation2 + $0xd]] }
  0x26   :  { %v40_v3 = vmul.f32 %v39_v1, %v37_v0  ;;  %v43_v4 = vmul.f32 %v42_v2, %v37_v0  ;;  %v45_v5 = vstv %s440_s6  ;;  %v48_v6 = vstv %s441_s7  ;;  %s668_s17 = sld [smem:[#allocation2 + $0xe]]  ;;  %s670_s18 = sld [smem:[#allocation2 + $0xf]] }
  0x27   :  { %v46_v8 = vmul.f32 %v45_v5, %v37_v0  ;;  %v49_v9 = vmul.f32 %v48_v6, %v37_v0  ;;  %v51_v10 = vstv %s442_s8  ;;  %v54_v11 = vstv %s443_s9  ;;  %s672_s19 = sld [smem:[#allocation2 + $0x10]]  ;;  %s674_s20 = sld [smem:[#allocation2 + $0x11]] }
  0x28   :  { %v52_v12 = vmul.f32 %v51_v10, %v37_v0  ;;  %v55_v13 = vmul.f32 %v54_v11, %v37_v0  ;;  %v59_v14 = vstv %s444_s10  ;;  %v63_v15 = vstv %s445_s11  ;;  %s676_s21 = sld [smem:[#allocation2 + $0x12]]  ;;  %s678_s22 = sld [smem:[#allocation2 + $0x13]] }
  0x29   :  { %v60_v16 = vmul.f32 %v59_v14, %v57_v7  ;;  %v64_v17 = vmul.f32 %v63_v15, %v57_v7  ;;  %v67_v18 = vstv %s656_s12  ;;  %v71_v19 = vstv %s658_s13  ;;  %s684_s23 = sld [smem:[#allocation2 + $0x14]]  ;;  %s686_s24 = sld [smem:[#allocation2 + $0x15]] }
  0x2a   :  { %v68_v20 = vmul.f32 %v67_v18, %v57_v7  ;;  %v72_v21 = vmul.f32 %v71_v19, %v57_v7  ;;  %v75_v22 = vstv %s660_s14  ;;  %v79_v23 = vstv %s662_s1  ;;  %s688_s25 = sld [smem:[#allocation2 + $0x16]]  ;;  %s690_s26 = sld [smem:[#allocation2 + $0x17]]  ;;  %v161_v19 = vld [vmem:[#allocation6 + $0x5] sm:$0x1] }
  0x2b   :  { %v61_v25 = vadd.f32 %v60_v16, %v40_v3  ;;  %v65_v26 = vadd.f32 %v64_v17, %v43_v4  ;;  %v76_v27 = vmul.f32 %v75_v22, %v57_v7  ;;  %v80_v28 = vmul.f32 %v79_v23, %v57_v7  ;;  %s694_s27 = sld [smem:[#allocation2 + $0x18]]  ;;  %s696_s28 = sld [smem:[#allocation2 + $0x19]] }
  0x2c   :  { %v69_v29 = vadd.f32 %v68_v20, %v46_v8  ;;  %v73_v30 = vadd.f32 %v72_v21, %v49_v9  ;;  %v85_v31 = vstv %s664_s15  ;;  %v89_v32 = vstv %s666_s16  ;;  %s702_s0 = sld [smem:[#allocation2 + $0x1a]]  ;;  %s704_s29 = sld [smem:[#allocation2 + $0x1b]] }
  0x2d   :  { %v77_v33 = vadd.f32 %v76_v27, %v52_v12  ;;  %v81_v34 = vadd.f32 %v80_v28, %v55_v13  ;;  %v86_v35 = vmul.f32 %v85_v31, %v83_v24  ;;  %v90_v36 = vmul.f32 %v89_v32, %v83_v24  ;;  %s708_s30 = sld [smem:[#allocation2 + $0x1c]]  ;;  %s710_s3 = sld [smem:[#allocation2 + $0x1d]] }
  0x2e   :  { %v93_v37 = vstv %s668_s17  ;;  %v97_v38 = vstv %s670_s18  ;;  %v101_v39 = vstv %s672_s19  ;;  %v105_v40 = vstv %s674_s20  ;;  %s712_s4 = sld [smem:[#allocation2 + $0x1e]]  ;;  %s714_s5 = sld [smem:[#allocation2 + $0x1f]] }
  0x2f   :  { %v87_v42 = vadd.f32 %v86_v35, %v61_v25  ;;  %v91_v43 = vadd.f32 %v90_v36, %v65_v26  ;;  %v94_v44 = vmul.f32 %v93_v37, %v83_v24  ;;  %v98_v45 = vmul.f32 %v97_v38, %v83_v24  ;;  %s718_s6 = sld [smem:[#allocation2 + $0x20]]  ;;  %s720_s7 = sld [smem:[#allocation2 + $0x21]]  ;;  %v187_v36 = vld [vmem:[#allocation6 + $0x6] sm:$0x1] }
  0x30   :  { %v102_v46 = vmul.f32 %v101_v39, %v83_v24  ;;  %v106_v47 = vmul.f32 %v105_v40, %v83_v24  ;;  %v111_v48 = vstv %s676_s21  ;;  %v115_v49 = vstv %s678_s22  ;;  %s726_s8 = sld [smem:[#allocation2 + $0x22]]  ;;  %s728_s9 = sld [smem:[#allocation2 + $0x23]] }
  0x31   :  { %v95_v50 = vadd.f32 %v94_v44, %v69_v29  ;;  %v99_v51 = vadd.f32 %v98_v45, %v73_v30  ;;  %v112_v52 = vmul.f32 %v111_v48, %v109_v41  ;;  %v116_v53 = vmul.f32 %v115_v49, %v109_v41  ;;  %s732_s10 = sld [smem:[#allocation2 + $0x24]]  ;;  %s734_s11 = sld [smem:[#allocation2 + $0x25]] }
  0x32   :  { %v103_v54 = vadd.f32 %v102_v46, %v77_v33  ;;  %v107_v55 = vadd.f32 %v106_v47, %v81_v34  ;;  %v119_v56 = vstv %s684_s23  ;;  %v123_v57 = vstv %s686_s24  ;;  %s736_s12 = sld [smem:[#allocation2 + $0x26]]  ;;  %s738_s13 = sld [smem:[#allocation2 + $0x27]] }
  0x33   :  { %v113_v58 = vadd.f32 %v112_v52, %v87_v42  ;;  %v117_v59 = vadd.f32 %v116_v53, %v91_v43  ;;  %v120_v60 = vmul.f32 %v119_v56, %v109_v41  ;;  %v124_v61 = vmul.f32 %v123_v57, %v109_v41  ;;  %s742_s14 = sld [smem:[#allocation2 + $0x28]]  ;;  %s744_s1 = sld [smem:[#allocation2 + $0x29]]  ;;  %v213_v53 = vld [vmem:[#allocation6 + $0x7] sm:$0x1] }
  0x34   :  { %v127_v63 = vstv %s688_s25  ;;  %v131_v0 = vstv %s690_s26  ;;  %v137_v1 = vstv %s694_s27  ;;  %v141_v2 = vstv %s696_s28  ;;  %s750_s15 = sld [smem:[#allocation2 + $0x2a]]  ;;  %s752_s16 = sld [smem:[#allocation2 + $0x2b]] }
  0x35   :  { %v121_v3 = vadd.f32 %v120_v60, %v95_v50  ;;  %v125_v4 = vadd.f32 %v124_v61, %v99_v51  ;;  %v128_v5 = vmul.f32 %v127_v63, %v109_v41  ;;  %v132_v6 = vmul.f32 %v131_v0, %v109_v41  ;;  %s756_s17 = sld [smem:[#allocation2 + $0x2c]]  ;;  %s758_s18 = sld [smem:[#allocation2 + $0x2d]] }
  0x36   :  { %v138_v7 = vmul.f32 %v137_v1, %v135_v62  ;;  %v142_v8 = vmul.f32 %v141_v2, %v135_v62  ;;  %v145_v9 = vstv %s702_s0  ;;  %v149_v10 = vstv %s704_s29  ;;  %s760_s19 = sld [smem:[#allocation2 + $0x2e]]  ;;  %s762_s20 = sld [smem:[#allocation2 + $0x2f]] }
  0x37   :  { %v129_v11 = vadd.f32 %v128_v5, %v103_v54  ;;  %v133_v12 = vadd.f32 %v132_v6, %v107_v55  ;;  %v146_v13 = vmul.f32 %v145_v9, %v135_v62  ;;  %v150_v14 = vmul.f32 %v149_v10, %v135_v62  ;;  %s766_s21 = sld [smem:[#allocation2 + $0x30]]  ;;  %s768_s22 = sld [smem:[#allocation2 + $0x31]] }
  0x38   :  { %v139_v15 = vadd.f32 %v138_v7, %v113_v58  ;;  %v143_v16 = vadd.f32 %v142_v8, %v117_v59  ;;  %v153_v17 = vstv %s708_s30  ;;  %v157_v18 = vstv %s710_s3  ;;  %s774_s23 = sld [smem:[#allocation2 + $0x32]]  ;;  %s776_s24 = sld [smem:[#allocation2 + $0x33]] }
  0x39   :  { %v147_v20 = vadd.f32 %v146_v13, %v121_v3  ;;  %v151_v21 = vadd.f32 %v150_v14, %v125_v4  ;;  %v154_v22 = vmul.f32 %v153_v17, %v135_v62  ;;  %v158_v23 = vmul.f32 %v157_v18, %v135_v62  ;;  %s780_s25 = sld [smem:[#allocation2 + $0x34]]  ;;  %s782_s26 = sld [smem:[#allocation2 + $0x35]] }
  0x3a   :  { %v163_v24 = vstv %s712_s4  ;;  %v167_v25 = vstv %s714_s5  ;;  %v171_v26 = vstv %s718_s6  ;;  %v175_v27 = vstv %s720_s7  ;;  %s790_s27 = sld [smem:[#allocation2 + $0x36]]  ;;  %s792_s28 = sld [smem:[#allocation2 + $0x37]] }
  0x3b   :  { %v155_v28 = vadd.f32 %v154_v22, %v129_v11  ;;  %v159_v29 = vadd.f32 %v158_v23, %v133_v12  ;;  %v164_v30 = vmul.f32 %v163_v24, %v161_v19  ;;  %v168_v31 = vmul.f32 %v167_v25, %v161_v19  ;;  %s794_s0 = sld [smem:[#allocation2 + $0x38]]  ;;  %s798_s29 = sld [smem:[#allocation2 + $0x39]] }
  0x3c   :  { %v172_v32 = vmul.f32 %v171_v26, %v161_v19  ;;  %v176_v33 = vmul.f32 %v175_v27, %v161_v19  ;;  %v179_v34 = vstv %s726_s8  ;;  %v183_v35 = vstv %s728_s9  ;;  %s800_s30 = sld [smem:[#allocation2 + $0x3a]]  ;;  %s802_s3 = sld [smem:[#allocation2 + $0x3b]] }
  0x3d   :  { %v165_v37 = vadd.f32 %v164_v30, %v139_v15  ;;  %v169_v38 = vadd.f32 %v168_v31, %v143_v16  ;;  %v180_v39 = vmul.f32 %v179_v34, %v161_v19  ;;  %v184_v40 = vmul.f32 %v183_v35, %v161_v19  ;;  %s804_s4 = sld [smem:[#allocation2 + $0x3c]]  ;;  %s808_s5 = sld [smem:[#allocation2 + $0x3d]] }
  0x3e   :  { %v173_v41 = vadd.f32 %v172_v32, %v147_v20  ;;  %v177_v42 = vadd.f32 %v176_v33, %v151_v21  ;;  %v189_v43 = vstv %s732_s10  ;;  %v193_v44 = vstv %s734_s11  ;;  %s810_s6 = sld [smem:[#allocation2 + $0x3e]]  ;;  %s812_s7 = sld [smem:[#allocation2 + $0x3f]] }
  0x3f   :  { %v181_v45 = vadd.f32 %v180_v39, %v155_v28  ;;  %v185_v46 = vadd.f32 %v184_v40, %v159_v29  ;;  %v190_v47 = vmul.f32 %v189_v43, %v187_v36  ;;  %v194_v48 = vmul.f32 %v193_v44, %v187_v36  ;;  %s814_s8 = sld [smem:[#allocation2 + $0x40]]  ;;  %s816_s9 = sld [smem:[#allocation2 + $0x41]] }
  0x40   :  { %v197_v49 = vstv %s736_s12  ;;  %v201_v50 = vstv %s738_s13  ;;  %v205_v51 = vstv %s742_s14  ;;  %v209_v52 = vstv %s744_s1  ;;  %s818_s10 = sld [smem:[#allocation2 + $0x42]]  ;;  %s820_s11 = sld [smem:[#allocation2 + $0x43]] }
  0x41   :  { %v191_v54 = vadd.f32 %v190_v47, %v165_v37  ;;  %v195_v55 = vadd.f32 %v194_v48, %v169_v38  ;;  %v198_v56 = vmul.f32 %v197_v49, %v187_v36  ;;  %v202_v57 = vmul.f32 %v201_v50, %v187_v36  ;;  %s822_s12 = sld [smem:[#allocation2 + $0x44]]  ;;  %s824_s13 = sld [smem:[#allocation2 + $0x45]] }
  0x42   :  { %v206_v58 = vmul.f32 %v205_v51, %v187_v36  ;;  %v210_v59 = vmul.f32 %v209_v52, %v187_v36  ;;  %v215_v60 = vstv %s750_s15  ;;  %v219_v61 = vstv %s752_s16  ;;  %s826_s14 = sld [smem:[#allocation2 + $0x46]]  ;;  %s828_s1 = sld [smem:[#allocation2 + $0x47]] }
  0x43   :  { %v199_v62 = vadd.f32 %v198_v56, %v173_v41  ;;  %v203_v63 = vadd.f32 %v202_v57, %v177_v42  ;;  %v216_v0 = vmul.f32 %v215_v60, %v213_v53  ;;  %v220_v1 = vmul.f32 %v219_v61, %v213_v53  ;;  %s830_s15 = sld [smem:[#allocation2 + $0x48]]  ;;  %s832_s16 = sld [smem:[#allocation2 + $0x49]] }
  0x44   :  { %v207_v2 = vadd.f32 %v206_v58, %v181_v45  ;;  %v211_v3 = vadd.f32 %v210_v59, %v185_v46  ;;  %v223_v4 = vstv %s756_s17  ;;  %v227_v5 = vstv %s758_s18  ;;  %s834_s17 = sld [smem:[#allocation2 + $0x4a]]  ;;  %s836_s18 = sld [smem:[#allocation2 + $0x4b]] }
  0x45   :  { %v217_v6 = vadd.f32 %v216_v0, %v191_v54  ;;  %v221_v7 = vadd.f32 %v220_v1, %v195_v55  ;;  %v224_v8 = vmul.f32 %v223_v4, %v213_v53  ;;  %v228_v9 = vmul.f32 %v227_v5, %v213_v53 }
  0x46   :  { %v231_v10 = vstv %s760_s19  ;;  %v235_v11 = vstv %s762_s20  ;;  %v239_v12 = vstv %s766_s21  ;;  %v246_v13 = vstv %s768_s22  ;;  %s838_s19 = sld [smem:[#allocation2 + $0x4c]]  ;;  %s840_s20 = sld [smem:[#allocation2 + $0x4d]] }
  0x47   :  { %v225_v14 = vadd.f32 %v224_v8, %v199_v62  ;;  %v229_v15 = vadd.f32 %v228_v9, %v203_v63  ;;  %v232_v16 = vmul.f32 %v231_v10, %v213_v53  ;;  %v236_v17 = vmul.f32 %v235_v11, %v213_v53  ;;  %s842_s21 = sld [smem:[#allocation2 + $0x4e]]  ;;  %s869_s22 = sld [smem:[#allocation2 + $0x4f]] }
  0x48   :  { %v240_v18 = vadd.f32 %v239_v12, %v217_v6  ;;  %v247_v19 = vadd.f32 %v246_v13, %v221_v7  ;;  %v253_v20 = vstv %s774_s23  ;;  %v260_v21 = vstv %s776_s24  ;;  %s871_s23 = sld [smem:[#allocation2 + $0x50]]  ;;  %s873_s24 = sld [smem:[#allocation2 + $0x51]] }
  0x49   :  { %v233_v22 = vadd.f32 %v232_v16, %v207_v2  ;;  %v237_v23 = vadd.f32 %v236_v17, %v211_v3  ;;  %v254_v24 = vadd.f32 %v253_v20, %v225_v14  ;;  %v261_v25 = vadd.f32 %v260_v21, %v229_v15 }
  0x4a   :  { %v241_v26 = vmul.f32 0.5, %v240_v18  ;;  %v248_v27 = vmul.f32 0.5, %v247_v19  ;;  %v267_v28 = vstv %s780_s25  ;;  %v274_v29 = vstv %s782_s26  ;;  %s520_s25 = sld [smem:[#allocation2 + $0x52]]  ;;  %s521_s26 = sld [smem:[#allocation2 + $0x53]] }
  0x4b   :  { %v255_v30 = vmul.f32 0.5, %v254_v24  ;;  %v262_v31 = vmul.f32 0.5, %v261_v25  ;;  %v268_v32 = vadd.f32 %v267_v28, %v233_v22  ;;  %v275_v33 = vadd.f32 %v274_v29, %v237_v23 }
  0x4c   :  { %530 = vtanh.f32 %v241_v26  ;;  %v281_v36 = vstv %s790_s27  ;;  %v284_v37 = vstv %s792_s28  ;;  %v287_v38 = vstv %s794_s0  ;;  %s522_s27 = sld [smem:[#allocation2 + $0x54]]  ;;  %s523_s28 = sld [smem:[#allocation2 + $0x55]] }
  0x4d   :  { %532 = vtanh.f32 %v248_v27  ;;  %v269_v34 = vmul.f32 0.5, %v268_v32  ;;  %v276_v35 = vmul.f32 0.5, %v275_v33  ;;  %v290_v39 = vstv %s798_s29  ;;  %s524_s0 = sld [smem:[#allocation2 + $0x56]]  ;;  %s616_s29 = smov [#allocation7]  }
  0x4e   :  { %534 = vtanh.f32 %v255_v30  ;;  %v293_v40 = vstv %s800_s30  ;;  %v297_v41 = vstv %s802_s3  ;;  %v301_v42 = vstv %s804_s4  ;;  %s429_s30 = sshll.u32 %s616_s29, 4  ;;  %s430_s30 = int_to_ptr.vmem [resolvable:$true] %s429_s30 }
  0x4f   :  { %536 = vtanh.f32 %v262_v31  ;;  %v305_v43 = vstv %s808_s5  ;;  %v309_v44 = vstv %s810_s6  ;;  %v313_v45 = vstv %s812_s7  ;;  %s584_s3 = scalar_lea.vmem %s430_s30, 16  ;;  %s588_s4 = scalar_lea.vmem %s430_s30, 32 }
  0x50   :  { %538 = vtanh.f32 %v269_v34  ;;  %v317_v46 = vstv %s814_s8  ;;  %v321_v48 = vstv %s816_s9  ;;  %v325_v49 = vstv %s818_s10  ;;  %p585_p11 = scmp.ne.s32.totalorder %s430_s30, %s584_s3  ;;  %p589_p12 = scmp.lt.s32.totalorder %s430_s30, %s430_s30 }
  0x51   :  { %540 = vtanh.f32 %v276_v35  ;;  %v329_v50 = vstv %s820_s11  ;;  %v333_v51 = vstv %s822_s12  ;;  %v337_v54 = vstv %s824_s13  ;;  %p590_p13 = scmp.lt.s32.totalorder %s588_s4, %s584_s3 }
  0x52   :  { %v341_v55 = vstv %s826_s14  ;;  %v345_v56 = vstv %s828_s1  ;;  %v349_v59 = vstv %s830_s15  ;;  %v353_v60 = vstv %s832_s16 }
  0x53   :  { %v357_v61 = vstv %s834_s17  ;;  %v361_v1 = vstv %s836_s18  ;;  %v365_v2 = vstv %s838_s19  ;;  %v369_v6 = vstv %s840_s20  ;;  %p591_p0 = por %p590_p13, %p589_p12 }
  0x54   :  { %v373_v7 = vstv %s842_s21 }
  0x55   :  { %p592_p1 = pnand %p591_p0, %p585_p11 }
  0x56   :  { %v531_v47 = vpop.eup %530 }
  0x57   :  { %v533_v52 = vpop.eup %532  ;;  %v243_v53 = vmul.f32 0.5, %v531_v47 }
  0x58   :  { %v535_v57 = vpop.eup %534  ;;  %v250_v58 = vmul.f32 0.5, %v533_v52 }
  0x59   :  { %v537_v62 = vpop.eup %536  ;;  %v244_v63 = vadd.f32 0.5, %v243_v53  ;;  %v257_v0 = vmul.f32 0.5, %v535_v57 }
  0x5a   :  { %v539_v3 = vpop.eup %538  ;;  %v251_v4 = vadd.f32 0.5, %v250_v58  ;;  %v264_v5 = vmul.f32 0.5, %v537_v62 }
  0x5b   :  { %v541_v8 = vpop.eup %540  ;;  %v258_v9 = vadd.f32 0.5, %v257_v0  ;;  %v271_v10 = vmul.f32 0.5, %v539_v3  ;;  %v282_v11 = vmul.f32 %v281_v36, %v244_v63  ;;  %v285_v12 = vmul.f32 %v284_v37, %v244_v63 }
  0x5c   :  { %v265_v13 = vadd.f32 0.5, %v264_v5  ;;  %v278_v14 = vmul.f32 0.5, %v541_v8  ;;  %v288_v15 = vmul.f32 %v287_v38, %v244_v63  ;;  %v291_v16 = vmul.f32 %v290_v39, %v244_v63 }
  0x5d   :  { %v272_v17 = vadd.f32 0.5, %v271_v10  ;;  %v294_v18 = vmul.f32 %v293_v40, %v251_v4  ;;  %v298_v19 = vmul.f32 %v297_v41, %v251_v4  ;;  %v302_v20 = vmul.f32 %v301_v42, %v251_v4 }
  0x5e   :  { %v279_v21 = vadd.f32 0.5, %v278_v14  ;;  %v306_v22 = vmul.f32 %v305_v43, %v251_v4  ;;  %v310_v23 = vmul.f32 %v309_v44, %v258_v9  ;;  %v314_v24 = vmul.f32 %v313_v45, %v258_v9 }
  0x5f   :  { %v295_v25 = vadd.f32 %v294_v18, %v282_v11  ;;  %v299_v26 = vadd.f32 %v298_v19, %v285_v12  ;;  %v303_v27 = vadd.f32 %v302_v20, %v288_v15  ;;  %v318_v28 = vmul.f32 %v317_v46, %v258_v9 }
  0x60   :  { %v307_v29 = vadd.f32 %v306_v22, %v291_v16  ;;  %v322_v30 = vmul.f32 %v321_v48, %v258_v9  ;;  %v326_v31 = vmul.f32 %v325_v49, %v265_v13  ;;  %v330_v32 = vmul.f32 %v329_v50, %v265_v13 }
  0x61   :  { %v311_v33 = vadd.f32 %v310_v23, %v295_v25  ;;  %v315_v34 = vadd.f32 %v314_v24, %v299_v26  ;;  %v319_v35 = vadd.f32 %v318_v28, %v303_v27  ;;  %v334_v36 = vmul.f32 %v333_v51, %v265_v13 }
  0x62   :  { %v323_v37 = vadd.f32 %v322_v30, %v307_v29  ;;  %v338_v38 = vmul.f32 %v337_v54, %v265_v13  ;;  %v342_v39 = vmul.f32 %v341_v55, %v272_v17  ;;  %v346_v40 = vmul.f32 %v345_v56, %v272_v17 }
  0x63   :  { %v327_v41 = vadd.f32 %v326_v31, %v311_v33  ;;  %v331_v42 = vadd.f32 %v330_v32, %v315_v34  ;;  %v335_v43 = vadd.f32 %v334_v36, %v319_v35  ;;  %v350_v44 = vmul.f32 %v349_v59, %v272_v17 }
  0x64   :  { %v339_v45 = vadd.f32 %v338_v38, %v323_v37  ;;  %v354_v46 = vmul.f32 %v353_v60, %v272_v17  ;;  %v358_v47 = vmul.f32 %v357_v61, %v279_v21  ;;  %v362_v48 = vmul.f32 %v361_v1, %v279_v21 }
  0x65   :  { %v343_v49 = vadd.f32 %v342_v39, %v327_v41  ;;  %v347_v50 = vadd.f32 %v346_v40, %v331_v42  ;;  %v351_v52 = vadd.f32 %v350_v44, %v335_v43  ;;  %v366_v53 = vmul.f32 %v365_v2, %v279_v21 }
  0x66   :  { %v355_v51 = vadd.f32 %v354_v46, %v339_v45  ;;  %v370_v57 = vmul.f32 %v369_v6, %v279_v21  ;;  %v380_v54 = vstv %s869_s22  ;;  %v387_v55 = vstv %s871_s23 }
  0x67   :  { %v359_v58 = vadd.f32 %v358_v47, %v343_v49  ;;  %v363_v56 = vadd.f32 %v362_v48, %v347_v50  ;;  %v367_v62 = vadd.f32 %v366_v53, %v351_v52  ;;  %v394_v63 = vstv %s873_s24 }
  0x68   :  { %v371_v0 = vadd.f32 %v370_v57, %v355_v51  ;;  %v401_v11 = vstv %s520_s25  ;;  %v404_v15 = vstv %s521_s26  ;;  %v408_v18 = vstv %s522_s27 }
  0x69   :  { %v374_v3 = vadd.f32 %v373_v7, %v359_v58  ;;  %v381_v59 = vadd.f32 %v380_v54, %v363_v56  ;;  %v388_v4 = vadd.f32 %v387_v55, %v367_v62  ;;  %v412_v21 = vstv %s523_s28 }
  0x6a   :  { %v395_v5 = vadd.f32 %v394_v63, %v371_v0  ;;  %v416_v28 = vstv %s524_s0 }
  0x6b   :  { %v375_v60 = vmul.f32 0.5, %v374_v3  ;;  %v382_v61 = vmul.f32 0.5, %v381_v59  ;;  %v389_v1 = vmul.f32 0.5, %v388_v4 }
  0x6c   :  { %v396_v8 = vmul.f32 0.5, %v395_v5 }
  0x6d   :  { %542 = vtanh.f32 %v375_v60 }
  0x6e   :  { %544 = vtanh.f32 %v382_v61 }
  0x6f   :  { %546 = vtanh.f32 %v389_v1 }
  0x70   :  { %548 = vtanh.f32 %v396_v8 }
  0x77   :  { %v543_v2 = vpop.eup %542 }
  0x78   :  { %v545_v6 = vpop.eup %544  ;;  %v377_v9 = vmul.f32 0.5, %v543_v2 }
  0x79   :  { %v547_v10 = vpop.eup %546  ;;  %v384_v7 = vmul.f32 0.5, %v545_v6 }
  0x7a   :  { %v549_v12 = vpop.eup %548  ;;  %v378_v13 = vadd.f32 0.5, %v377_v9  ;;  %v391_v14 = vmul.f32 0.5, %v547_v10 }
  0x7b   :  { %v385_v16 = vadd.f32 0.5, %v384_v7  ;;  %v398_v17 = vmul.f32 0.5, %v549_v12 }
  0x7c   :  { %v392_v19 = vadd.f32 0.5, %v391_v14  ;;  %v402_v20 = vmul.f32 %v401_v11, %v378_v13 }
  0x7d   :  { %v399_v22 = vadd.f32 0.5, %v398_v17  ;;  %v405_v23 = vmul.f32 %v404_v15, %v385_v16 }
  0x7e   :  { %v409_v24 = vmul.f32 %v408_v18, %v392_v19 }
  0x7f   :  { %v406_v25 = vadd.f32 %v405_v23, %v402_v20  ;;  %v413_v26 = vmul.f32 %v412_v21, %v399_v22 }
  0x81   :  { %v410_v27 = vadd.f32 %v409_v24, %v406_v25 }
  0x83   :  { %v414_v29 = vadd.f32 %v413_v26, %v410_v27 }
  0x85   :  { %v417_v30 = vadd.f32 %v416_v28, %v414_v29 }
  0x87   :  { %v418_v31 = vmul.f32 0.5, %v417_v30 }
  0x89   :  { %550 = vtanh.f32 %v418_v31 }
  0x93   :  { %v551_v32 = vpop.eup %550 }
  0x94   :  { %v420_v33 = vmul.f32 0.5, %v551_v32 }
  0x96   :  { %v421_v34 = vadd.f32 0.5, %v420_v33 }
  0x98   :  { %422 = vst [vmem:[#allocation7] sm:$0x1] %v421_v34 }
  0x99   :  { %595 = shalt.err (!%p592_p1)
}
  0x9a   :  { %s596_s7 = scalar_lea.hbm %s892_s2, 16 }
  0x9b   :  { %p597_p2 = scmp.ne.s32.totalorder %s892_s2, %s596_s7  ;;  %p600_p3 = scmp.lt.u32.totalorder %s596_s7, %s892_s2 }
  0x9d   :  { %p602_p4 = pnand %p600_p3, %p597_p2 }
  0x9f   :  { %605 = shalt.err (!%p602_p4)
}
  0xa0   :  { %432 = dma.vmem_to_hbm [thread:$0]  %s430_s30, 16, %s892_s2, [#allocation4]  }
  0xa1   :  { %610 = dma.done.wait [#allocation4], 16  }
  0xa2   :  { %611 = vsyncadd [#allocation4], 4294967280 }
  0xa3   :  { %436 = vsyncpa [#allocation3], 1 }
  0xa4   :  { %437 = vsyncpa [#allocation4], 1 }
  0xa5   :  { %438 = vsyncpa [#allocation5], 1 }

</bundles_post_ra>
